<compile_context>
chip_gen: v6e
topology: v6e:2x2x1
jax: 0.10.0
libtpu: 0.0.40
codegen_flags: <defaults>
</compile_context>

<pallas_src>
import functools

import jax
import jax.numpy as jnp
from jax.experimental import pallas as pl
from jax.experimental.pallas import tpu as pltpu

LANES = 128
SUBLANES = 8
TARGET_BLOCK_BYTES = 2 << 20      # ~2 MiB per grid step: ~85%+ of HBM roofline
MIN_BLOCK_BYTES = 256 << 10       # below this, prefer padding up to big blocks
_TINY = 1e-30                     # guard: all-zero input would otherwise divide by zero


# ----------------------------- shared quant math -----------------------------
def _round_half_away_from_zero(q):
    # sign(q) * floor(|q| + 0.5) rewritten with floor/ceil + select.
    # (Half away from zero; NOT jnp.round, which is half-to-even.)
    return jnp.where(q >= 0.0, jnp.floor(q + 0.5), jnp.ceil(q - 0.5))


def _fake_quant(x_f32, absmax, qn, qp):
    absmax = jnp.maximum(absmax, _TINY)          # degenerate all-zero input guard
    alpha = (2.0 * absmax) / (qp - qn)           # scalar
    inv_alpha = (qp - qn) / (2.0 * absmax)       # scalar: no per-element divide
    q = jnp.clip(x_f32 * inv_alpha, qn, qp)
    q = _round_half_away_from_zero(q)
    return q * alpha


# --------------------------------- kernels -----------------------------------
def _fused_quant_kernel(x_ref, o_ref, *, qn, qp):
    """Whole slab resident in VMEM: abs-max + quantize in one pass (2N HBM traffic)."""
    x = x_ref[...].astype(jnp.float32)
    absmax = jnp.max(jnp.abs(x))
    o_ref[...] = _fake_quant(x, absmax, qn, qp).astype(o_ref.dtype)


def _absmax_partial_kernel(x_ref, out_ref):
    """Pass 1: per-tile |x| max, broadcast into this tile's own (8, 128) output block.

    Every grid step writes an independent block ("parallel" semantics), so there is no
    serial SMEM read-modify-write chain and v7x can shard tiles across both TensorCores.
    """
    tile_max = jnp.max(jnp.abs(x_ref[...].astype(jnp.float32)))
    out_ref[...] = jnp.full((SUBLANES, LANES), tile_max, dtype=jnp.float32)


def _quant_kernel(absmax_ref, x_ref, o_ref, *, qn, qp):
    """Pass 2: elementwise fake-quantize with the global abs-max scalar in SMEM."""
    x = x_ref[...].astype(jnp.float32)
    o_ref[...] = _fake_quant(x, absmax_ref[0, 0], qn, qp).astype(o_ref.dtype)


# -------------------------------- helpers ------------------------------------
def _round_up(a, b):
    return ((a + b - 1) // b) * b


def _vmem_capacity_bytes():
    default = 64 << 20  # conservative (v7x per-TensorCore VMEM)
    try:
        info_fn = getattr(pltpu, "get_tpu_info", None)
        if info_fn is None:
            return default
        cap = getattr(info_fn(), "vmem_capacity_bytes", None)
        return int(cap) if cap else default
    except Exception:
        return default


def _clamp_limit(needed, usable):
    return int(min(usable, max(needed, 16 << 20)))


def _pick_tile_rows(rows, target_rows):
    """Largest multiple of 8 that divides `rows` and is <= target_rows (None if impossible)."""
    if rows % SUBLANES != 0:
        return None
    t = min(target_rows, rows)
    t -= t % SUBLANES
    while t >= SUBLANES:
        if rows % t == 0:
            return t
        t -= SUBLANES
    return None


def _fused_quantize(x2d, qn, qp, vmem_limit):
    rows, lanes = x2d.shape
    return pl.pallas_call(
        functools.partial(_fused_quant_kernel, qn=qn, qp=qp),
        out_shape=jax.ShapeDtypeStruct((rows, lanes), x2d.dtype),
        grid=(1,),
        in_specs=[pl.BlockSpec((rows, lanes), lambda i: (0, 0))],
        out_specs=pl.BlockSpec((rows, lanes), lambda i: (0, 0)),
        compiler_params=pltpu.CompilerParams(vmem_limit_bytes=vmem_limit),
    )(x2d)


def _two_pass_quantize(x2d, tile_rows, qn, qp, usable_vmem):
    rows, _ = x2d.shape
    num_tiles = rows // tile_rows
    block_bytes = tile_rows * LANES * x2d.dtype.itemsize
    vmem_limit = _clamp_limit(4 * block_bytes + (2 << 20), usable_vmem)

    # Pass 1: per-tile abs-max partials (fully parallel across the grid).
    partial = pl.pallas_call(
        _absmax_partial_kernel,
        out_shape=jax.ShapeDtypeStruct((num_tiles * SUBLANES, LANES), jnp.float32),
        grid=(num_tiles,),
        in_specs=[pl.BlockSpec((tile_rows, LANES), lambda i: (i, 0))],
        out_specs=pl.BlockSpec((SUBLANES, LANES), lambda i: (i, 0)),
        compiler_params=pltpu.CompilerParams(
            dimension_semantics=("parallel",),
            vmem_limit_bytes=vmem_limit),
    )(x2d)

    # Tiny XLA reduction over the partials (num_tiles * 1024 floats).
    absmax = jnp.max(partial).reshape(1, 1)

    # Pass 2: elementwise quantize / dequantize.
    return pl.pallas_call(
        functools.partial(_quant_kernel, qn=qn, qp=qp),
        out_shape=jax.ShapeDtypeStruct((rows, LANES), x2d.dtype),
        grid=(num_tiles,),
        in_specs=[
            pl.BlockSpec(memory_space=pltpu.SMEM),               # absmax scalar
            pl.BlockSpec((tile_rows, LANES), lambda i: (i, 0)),  # activation tile
        ],
        out_specs=pl.BlockSpec((tile_rows, LANES), lambda i: (i, 0)),
        compiler_params=pltpu.CompilerParams(
            dimension_semantics=("parallel",),
            vmem_limit_bytes=vmem_limit),
    )(absmax, x2d)


# ------------------------------- public wrapper -------------------------------
def qat_activation_quantize(activation, a_bits=8, all_positive=False,
                            _force_two_pass=False):
    """Pallas implementation of QATActivationQuantizer.forward."""
    if a_bits == 32:
        return activation
    assert a_bits != 1, "Binary quantization is not supported"

    if all_positive:
        qn, qp = 0.0, float(2 ** a_bits - 1)
    else:
        qn, qp = float(-(2 ** (a_bits - 1))), float(2 ** (a_bits - 1) - 1)

    orig_shape = activation.shape
    orig_dtype = activation.dtype
    n = activation.size
    itemsize = jnp.dtype(orig_dtype).itemsize

    vmem_cap = _vmem_capacity_bytes()
    usable_vmem = max(vmem_cap - (16 << 20), vmem_cap // 2)

    # Build a lane-dense (rows, 128) slab in the ORIGINAL dtype (no f32 copy).
    if n % LANES == 0:
        rows = n // LANES
        x2d = activation.reshape(rows, LANES)     # contiguous reshape -> free bitcast
        padded = False
    else:
        rows = _round_up(pl.cdiv(n, LANES), SUBLANES)
        pad = rows * LANES - n
        x2d = jnp.pad(activation.reshape(-1), (0, pad)).reshape(rows, LANES)
        padded = True

    slab_bytes = rows * LANES * itemsize
    target_rows = max(SUBLANES,
                      (TARGET_BLOCK_BYTES // (LANES * itemsize)) // SUBLANES * SUBLANES)

    fused_need = 4 * slab_bytes + (4 << 20)       # in + out, double-buffer headroom
    if fused_need <= usable_vmem and not _force_two_pass:
        out2d = _fused_quantize(x2d, qn, qp, _clamp_limit(fused_need, usable_vmem))
    else:
        tile_rows = _pick_tile_rows(rows, target_rows)
        if tile_rows is not None and tile_rows * LANES * itemsize < MIN_BLOCK_BYTES:
            tile_rows = None                      # tiny blocks: padding to big blocks wins
        if tile_rows is None:
            tile_rows = min(target_rows, _round_up(rows, SUBLANES))
            rows_p = _round_up(rows, tile_rows)
            if rows_p != rows:
                x2d = jnp.pad(x2d, ((0, rows_p - rows), (0, 0)))
                rows = rows_p
                padded = True
        out2d = _two_pass_quantize(x2d, tile_rows, qn, qp, usable_vmem)

    if padded:
        return out2d.reshape(-1)[:n].reshape(orig_shape)
    return out2d.reshape(orig_shape)


# ------------------------------ pure-JAX reference ----------------------------
def _reference(activation, a_bits=8, all_positive=False):
    """Mirrors the PyTorch forward (QAT.apply) for verification."""
    if a_bits == 32:
        return activation
    if all_positive:
        qn, qp = 0.0, float(2 ** a_bits - 1)
    else:
        qn, qp = float(-(2 ** (a_bits - 1))), float(2 ** (a_bits - 1) - 1)
    x = activation.astype(jnp.float32)
    absmax = jnp.maximum(jnp.abs(jnp.min(x)), jnp.max(x))   # == max(|x|)
    return _fake_quant(x, absmax, qn, qp).astype(activation.dtype)


if __name__ == "__main__":
    a_bits = 8
    key = jax.random.PRNGKey(0)
    k1, k2 = jax.random.split(key)

    # NCHW activation, numel % 128 == 0 -> no pad, fused single-pass path.
    x = jax.random.normal(k1, (2, 4, 16, 16), dtype=jnp.float32)
    out = jax.block_until_ready(qat_activation_quantize(x, a_bits=a_bits))
    ref = _reference(x, a_bits=a_bits)
    assert out.shape == x.shape and out.dtype == x.dtype
    assert float(jnp.max(jnp.abs(out - ref))) < 1e-5, "fused path mismatch vs reference"

    # Exercise the tiled two-pass kernels (abs-max partials + quantize) as well.
    out2 = jax.block_until_ready(
        qat_activation_quantize(x, a_bits=a_bits, _force_two_pass=True))
    assert float(jnp.max(jnp.abs(out2 - ref))) < 1e-5, "two-pass path mismatch vs reference"

    # Ragged size (numel % 128 != 0) -> padded fallback path.
    xr = jax.random.normal(k2, (3, 5, 7, 11), dtype=jnp.float32)
    outr = jax.block_until_ready(qat_activation_quantize(xr, a_bits=a_bits))
    refr = _reference(xr, a_bits=a_bits)
    assert outr.shape == xr.shape and outr.dtype == xr.dtype
    assert float(jnp.max(jnp.abs(outr - refr))) < 1e-5, "padded path mismatch vs reference"

    print("KERNEL_OK")
</pallas_src>

<mosaic_0001>
module attributes {stable_mosaic.version = 11 : i64} {
  func.func @_fused_quant_kernel(%arg0: i32, %arg1: memref<16x128xf32, #tpu.memory_space<vmem>>, %arg2: memref<16x128xf32, #tpu.memory_space<vmem>>) attributes {dimension_semantics = [#tpu.dimension_semantics<arbitrary>], iteration_bounds = array<i64: 1>, scalar_prefetch = 0 : i64, scratch_operands = 0 : i64, tpu.core_type = #tpu.core_type<tc>, window_params = [{pipeline_mode = #tpu.pipeline_mode<synchronous>, transform_indices = @transform_0, window_bounds = array<i64: 16, 128>}, {pipeline_mode = #tpu.pipeline_mode<synchronous>, transform_indices = @transform_1, window_bounds = array<i64: 16, 128>}]} {
    %c0 = arith.constant 0 : index
    %c0_0 = arith.constant 0 : index
    %0 = vector.load %arg1[%c0, %c0_0] : memref<16x128xf32, #tpu.memory_space<vmem>>, vector<16x128xf32>
    %1 = math.absf %0 : vector<16x128xf32>
    %2 = vector.shape_cast %1 : vector<16x128xf32> to vector<1x16x128xf32>
    %cst = arith.constant dense<0xFF800000> : vector<1xf32>
    %3 = vector.multi_reduction <maximumf>, %2, %cst [1, 2] : vector<1x16x128xf32> to vector<1xf32>
    %4 = vector.shape_cast %3 : vector<1xf32> to vector<1x1x1xf32>
    %5 = vector.extract %4[0, 0, 0] : f32 from vector<1x1x1xf32>
    %cst_1 = arith.constant 1.000000e-30 : f32
    %6 = arith.maximumf %5, %cst_1 : f32
    %cst_2 = arith.constant 2.000000e+00 : f32
    %7 = arith.mulf %cst_2, %6 : f32
    %cst_3 = arith.constant 2.550000e+02 : f32
    %8 = arith.divf %7, %cst_3 : f32
    %cst_4 = arith.constant 2.000000e+00 : f32
    %9 = arith.mulf %cst_4, %6 : f32
    %cst_5 = arith.constant 2.550000e+02 : f32
    %10 = arith.divf %cst_5, %9 : f32
    %11 = vector.broadcast %10 : f32 to vector<16x128xf32>
    %12 = arith.mulf %0, %11 : vector<16x128xf32>
    %cst_6 = arith.constant -1.280000e+02 : f32
    %cst_7 = arith.constant 1.270000e+02 : f32
    %13 = vector.broadcast %cst_6 : f32 to vector<16x128xf32>
    %14 = arith.maximumf %13, %12 : vector<16x128xf32>
    %15 = vector.broadcast %cst_7 : f32 to vector<16x128xf32>
    %16 = arith.minimumf %15, %14 : vector<16x128xf32>
    %cst_8 = arith.constant 0.000000e+00 : f32
    %17 = vector.broadcast %cst_8 : f32 to vector<16x128xf32>
    %18 = arith.cmpf oge, %16, %17 : vector<16x128xf32>
    %cst_9 = arith.constant 5.000000e-01 : f32
    %19 = vector.broadcast %cst_9 : f32 to vector<16x128xf32>
    %20 = arith.addf %16, %19 : vector<16x128xf32>
    %21 = math.floor %20 : vector<16x128xf32>
    %cst_10 = arith.constant 5.000000e-01 : f32
    %22 = vector.broadcast %cst_10 : f32 to vector<16x128xf32>
    %23 = arith.subf %16, %22 : vector<16x128xf32>
    %24 = math.ceil %23 : vector<16x128xf32>
    %25 = arith.select %18, %21, %24 : vector<16x128xi1>, vector<16x128xf32>
    %26 = vector.broadcast %8 : f32 to vector<16x128xf32>
    %27 = arith.mulf %25, %26 : vector<16x128xf32>
    %c0_11 = arith.constant 0 : index
    %c0_12 = arith.constant 0 : index
    %28 = vector.load %arg2[%c0_11, %c0_12] : memref<16x128xf32, #tpu.memory_space<vmem>>, vector<16x128xf32>
    tpu.vector_store %arg2[%c0_11, %c0_12], %27 {strides = array<i32>} : memref<16x128xf32, #tpu.memory_space<vmem>>, vector<16x128xf32>,
    return
  }
  func.func @transform_0(%arg0: i32) -> (i32, i32) {
    %c0_i32 = arith.constant 0 : i32
    %c0_i32_0 = arith.constant 0 : i32
    %c0_i32_1 = arith.constant 0 : i32
    return %c0_i32, %c0_i32_0 : i32, i32
  }
  func.func @transform_1(%arg0: i32) -> (i32, i32) {
    %c0_i32 = arith.constant 0 : i32
    %c0_i32_0 = arith.constant 0 : i32
    %c0_i32_1 = arith.constant 0 : i32
    return %c0_i32, %c0_i32_0 : i32, i32
  }
}

</mosaic_0001>

<bundles_post_ra>
// kernel: tpu_custom_call.1
= control target key start
LH: loop header
LB: loop body
LE: loop exit
PB: predicated region body
PF: predicated region fallthrough
CT: control target
= control target key end

     0   :  { %6 = vsyncpa [#allocation3], 0  ;;  %s171_s0 = inlined_call_operand.hbm [shape: f32[16,128], index: 0, kind: input, shape index: {}]   ;;  %s172_s1 = inlined_call_operand.hbm [shape: f32[16,128], index: 1, kind: output, shape index: {}]  }
   0x1   :  { %7 = vsyncpa [#allocation4], 0  ;;  %s144_s6 = smov [#allocation2]  }
   0x2   :  { %s13_s7 = sshll.u32 %s144_s6, 4  ;;  %s14_s7 = int_to_ptr.vmem [resolvable:$true] %s13_s7 }
   0x3   :  { %s108_s8 = scalar_lea.vmem %s14_s7, 256  ;;  %p113_p1 = scmp.lt.s32.totalorder %s14_s7, %s14_s7 }
   0x4   :  { %p109_p0 = scmp.ne.s32.totalorder %s14_s7, %s108_s8  ;;  %p114_p2 = scmp.lt.s32.totalorder %s108_s8, %s108_s8 }
   0x6   :  { %p115_p3 = por %p114_p2, %p113_p1 }
   0x8   :  { %p116_p4 = pnand %p115_p3, %p109_p0 }
   0xa   :  { %119 = shalt.err (!%p116_p4)
}
   0xb   :  { %s145_s9 = smov 128   ;;  %s146_s10 = smov 8  }
   0xc   :  { %19 = dma.hbm_to_vmem [thread:$0]  %s171_s0, 256, %s14_s7, [#allocation3], %s145_s9, %s145_s9, %s146_s10  }
   0xd   :  { %140 = dma.done.wait [#allocation3], 256  }
   0xe   :  { %141 = vsyncadd [#allocation3], 4294967040  ;;  %v23_v0 = vld [vmem:[#allocation2] sm:$0xff]  ;;  %v24_v1 = vld [vmem:[#allocation2 + $0x8] sm:$0xff]  ;;  %s147_s14 = smov 1e-30  }
   0xf   :  { %v25_v2 = vand.u32 2147483647, %v23_v0  ;;  %v26_v3 = vand.u32 2147483647, %v24_v1  ;;  %s148_s19 = smov [#allocation5]  }
  0x10   :  { %s75_s20 = sshll.u32 %s148_s19, 4  ;;  %s76_s20 = int_to_ptr.vmem [resolvable:$true] %s75_s20 }
  0x11   :  { %v27_v4 = vmax.f32.f32 %v25_v2, %v26_v3  ;;  %s120_s21 = scalar_lea.vmem %s76_s20, 256  ;;  %p125_p6 = scmp.lt.s32.totalorder %s76_s20, %s76_s20 }
  0x12   :  { %p121_p5 = scmp.ne.s32.totalorder %s76_s20, %s120_s21  ;;  %p126_p7 = scmp.lt.s32.totalorder %s120_s21, %s120_s21 }
  0x13   :  { %28 = vmax.xlane.f32.xlu0 %v27_v4 }
  0x14   :  { %p127_p8 = por %p126_p7, %p125_p6 }
  0x16   :  { %p128_p9 = pnand %p127_p8, %p121_p5 }
  0x9c   :  { %v29_v5 = vpop.xlane.xlu0 %28 }
  0x9d   :  { %v30_v6 = vrot.slane %v29_v5, 4 }
  0x9f   :  { %v31_v7 = vmax.f32 %v29_v5, %v30_v6 }
  0xa1   :  { %v32_v8 = vrot.slane %v31_v7, 2 }
  0xa3   :  { %v33_v9 = vmax.f32 %v31_v7, %v32_v8 }
  0xa5   :  { %v34_v10 = vrot.slane %v33_v9, 1 }
  0xa7   :  { %v35_v11 = vmax.f32 %v33_v9, %v34_v10 }
  0xa9   :  { %89 = vpush %v35_v11 }
  0xda   :  { %s90_s13 = spop %89 }
  0xdb   :  { %s37_s15 = smax.f32 %s147_s14, %s90_s13 }
  0xdc   :  { %s38_s0 = smul.f32 2.0, %s37_s15 }
  0xde   :  { %v42_v12 = vstv %s38_s0  ;;  %s41_s18 = smul.f32 0.003921569, %s38_s0 }
  0xdf   :  { %98 = vrcp.f32 %v42_v12 }
  0xe0   :  { %v65_v29 = vstv %s41_s18 }
  0xec   :  { %v99_v13 = vpop.eup %98 }
  0xed   :  { %91 = vpush %v99_v13 }
 0x11e   :  { %s92_s16 = spop %91 }
 0x11f   :  { %s45_s17 = smul.f32 255.0, %s92_s16 }
 0x121   :  { %v46_v14 = vstv %s45_s17 }
 0x122   :  { %v47_v15 = vmul.f32 %v46_v14, %v23_v0  ;;  %v48_v16 = vmul.f32 %v46_v14, %v24_v1 }
 0x124   :  { %v49_v17 = vmax.f32 %v47_v15, -128.0  ;;  %v50_v18 = vmax.f32 %v48_v16, -128.0 }
 0x126   :  { %v51_v19 = vmin.f32 %v49_v17, 127.0  ;;  %v52_v20 = vmin.f32 %v50_v18, 127.0 }
 0x128   :  { %v55_v21 = vadd.f32 0.5, %v51_v19  ;;  %v56_v22 = vadd.f32 0.5, %v52_v20  ;;  %v87_v23 = vadd.f32 -0.5, %v51_v19  ;;  %v88_v24 = vadd.f32 -0.5, %v52_v20 }
 0x129   :  { %vm53_vm0 = vcmp.ge.f32.partialorder %v51_v19, 0.0  ;;  %vm54_vm1 = vcmp.ge.f32.partialorder %v52_v20, 0.0 }
 0x12a   :  { %v57_v25 = vfloor.f32 %v55_v21  ;;  %v58_v26 = vfloor.f32 %v56_v22  ;;  %v61_v27 = vceil.f32 %v87_v23  ;;  %v62_v28 = vceil.f32 %v88_v24 }
 0x12c   :  { %v63_v30 = vsel %vm53_vm0, %v57_v25, %v61_v27  ;;  %v64_v31 = vsel %vm54_vm1, %v58_v26, %v62_v28 }
 0x12d   :  { %v66_v32 = vmul.f32 %v65_v29, %v63_v30  ;;  %v67_v33 = vmul.f32 %v65_v29, %v64_v31 }
 0x12f   :  { %68 = vst [vmem:[#allocation5] sm:$0xff] %v66_v32  ;;  %69 = vst [vmem:[#allocation5 + $0x8] sm:$0xff] %v67_v33 }
 0x130   :  { %131 = shalt.err (!%p128_p9)
}
 0x131   :  { %81 = dma.vmem_to_hbm [thread:$0]  %s76_s20, 256, %s172_s1, [#allocation4], %s145_s9, %s145_s9, %s146_s10  }
 0x132   :  { %142 = dma.done.wait [#allocation4], 256  }
 0x133   :  { %143 = vsyncadd [#allocation4], 4294967040 }
 0x134   :  { %85 = vsyncpa [#allocation3], 1 }
 0x135   :  { %86 = vsyncpa [#allocation4], 1 }

</bundles_post_ra>
